<compile_context>
chip_gen: v7x
topology: tpu7x:2x2x1
jax: 0.10.0
libtpu: 0.0.40
codegen_flags: <defaults>
</compile_context>

<pallas_src>
import jax
import jax.numpy as jnp
from jax.experimental import pallas as pl
from jax.experimental.pallas import tpu as pltpu

D_MODEL = 32
D_HIDDEN = 64
NUM_LAYERS = 2
LN_EPS = 1e-5                   # torch.nn.LayerNorm default
PACK = 128 // D_MODEL           # tokens packed per 128-lane row (=4)
PD = PACK * D_MODEL             # 128 packed model lanes
PH = PACK * D_HIDDEN            # 256 packed hidden lanes

# Conservative per-packed-row VMEM footprint (double-buffered in/out tiles +
# f32/bf16 intermediates inside the kernel), used for generation-aware tiling.
ROW_BYTES = 8192


def _round_up(x, m):
    return ((x + m - 1) // m) * m


def _cdiv(a, b):
    return -(-a // b)


def _block_diag(w, repeat):
    """(din, dout) -> (repeat*din, repeat*dout) block-diagonal matrix."""
    din, dout = w.shape
    eye = jnp.eye(repeat, dtype=w.dtype)
    return (eye[:, None, :, None] * w[None, :, None, :]).reshape(
        repeat * din, repeat * dout)


def _chip_caps():
    """(scoped-VMEM budget bytes, TensorCores per chip), generation-aware."""
    vmem_scoped = 32 << 20       # v6e / v7x default scoped-VMEM limit
    n_tc = 1
    try:
        kind = jax.devices()[0].device_kind.lower()
        if "v5" in kind:
            vmem_scoped = 16 << 20
        if "v7" in kind:
            n_tc = 2             # only v7x has 2 TCs a ("parallel",) grid uses
    except Exception:
        pass
    return vmem_scoped, n_tc


def _choose_tile_rows(n_rows, vmem_budget, n_tc):
    """Pick the packed-row tile: big tiles amortize ~0.35us/step overhead."""
    if n_rows <= 8:
        return n_rows                         # one full block (== array dim)
    cap = (vmem_budget // 2) // ROW_BYTES     # half the budget for row tiles
    cap = max(8, min(4096, (cap // 8) * 8))
    tile = min(_round_up(n_rows, 8), cap)
    if n_tc >= 2:
        # keep >=2 grid steps so both v7x TensorCores get work
        tile = min(tile, _round_up(_cdiv(n_rows, 2), 8))
    return tile


def mamba_encoder_kernel(x_ref, w1_ref, w2_ref, mavg_ref, p_ref, o_ref):
    # x_ref / o_ref : (TR, 128)  -- 4 tokens per lane-dense row, native dtype
    # w1_ref        : (L, 128, 256) bf16 block-diagonal W1 per layer
    # w2_ref        : (L, 256, 128) bf16 block-diagonal W2 per layer
    # mavg_ref      : (128, 128) f32 per-token-group averaging matrix
    # p_ref         : (2L+2, 256) f32 packed [b1 | b2 | gamma | beta]
    x = x_ref[...].astype(jnp.float32)

    # Sequential application of cloned layers (MambaEncoder.forward loop).
    # bf16 operands, f32 accumulation -> native MXU path on all generations.
    for l in range(NUM_LAYERS):
        h = jnp.dot(x.astype(jnp.bfloat16), w1_ref[l],
                    preferred_element_type=jnp.float32)
        h = jnp.maximum(h + p_ref[l:l + 1, :], 0.0)                  # bias+ReLU
        y = jnp.dot(h.astype(jnp.bfloat16), w2_ref[l],
                    preferred_element_type=jnp.float32)
        x = x + y + p_ref[NUM_LAYERS + l:NUM_LAYERS + l + 1, :PD]    # residual

    # Final norm: LayerNorm over each 32-lane token group, done lane-dense via
    # a block-diagonal averaging matmul.  Kept in f32 operands for accuracy
    # (memory-bound regime after the bf16 switch, so the f32 MXU cost is hidden).
    mavg = mavg_ref[...]
    mu = jnp.dot(x, mavg, preferred_element_type=jnp.float32)
    xc = x - mu
    var = jnp.dot(xc * xc, mavg, preferred_element_type=jnp.float32)
    xn = xc * jax.lax.rsqrt(var + LN_EPS)
    gamma = p_ref[2 * NUM_LAYERS:2 * NUM_LAYERS + 1, :PD]
    beta = p_ref[2 * NUM_LAYERS + 1:2 * NUM_LAYERS + 2, :PD]
    o_ref[...] = (xn * gamma + beta).astype(o_ref.dtype)


def mamba_encoder(src, w1, b1, w2, b2, gamma, beta):
    """src: (B, L, D) -> (B, L, D), dtype preserved."""
    B, L, D = src.shape
    assert D == D_MODEL
    N = B * L

    # ---- lane-dense packing: 4 tokens per 128-lane row (free reshape) ----
    x2d = src.reshape(N, D)                       # native dtype, no host astype
    if N % PACK:
        # TODO(synk): token counts not divisible by 4 still pay one XLA pad.
        x2d = jnp.pad(x2d, ((0, PACK - N % PACK), (0, 0)))
    n_rows = x2d.shape[0] // PACK
    xp = x2d.reshape(n_rows, PD)

    vmem_budget, n_tc = _chip_caps()
    tile_r = _choose_tile_rows(n_rows, vmem_budget, n_tc)
    grid = _cdiv(n_rows, tile_r)
    # NOTE: no row padding — Pallas handles the ragged boundary block (OOB
    # reads are row-local garbage discarded by masked OOB writes).

    # ---- block-diagonal bf16 weights so packed-row matmuls are exact per token
    w1_big = jnp.stack(
        [_block_diag(w1[l], PACK) for l in range(NUM_LAYERS)]).astype(jnp.bfloat16)
    w2_big = jnp.stack(
        [_block_diag(w2[l], PACK) for l in range(NUM_LAYERS)]).astype(jnp.bfloat16)

    # per-token-group averaging matrix for LayerNorm (f32)
    gid = jnp.arange(PD) // D_MODEL
    mavg = (gid[:, None] == gid[None, :]).astype(jnp.float32) / D_MODEL

    # all small per-layer vectors packed into one f32 block
    params = jnp.zeros((2 * NUM_LAYERS + 2, PH), jnp.float32)
    params = params.at[:NUM_LAYERS, :].set(
        jnp.tile(b1.astype(jnp.float32), (1, PACK)))
    params = params.at[NUM_LAYERS:2 * NUM_LAYERS, :PD].set(
        jnp.tile(b2.astype(jnp.float32), (1, PACK)))
    params = params.at[2 * NUM_LAYERS, :PD].set(
        jnp.tile(gamma.astype(jnp.float32), PACK))
    params = params.at[2 * NUM_LAYERS + 1, :PD].set(
        jnp.tile(beta.astype(jnp.float32), PACK))

    out = pl.pallas_call(
        mamba_encoder_kernel,
        out_shape=jax.ShapeDtypeStruct((n_rows, PD), src.dtype),
        grid_spec=pltpu.PrefetchScalarGridSpec(
            num_scalar_prefetch=0,
            grid=(grid,),
            in_specs=[
                pl.BlockSpec((tile_r, PD), lambda i: (i, 0)),               # x
                pl.BlockSpec((NUM_LAYERS, PD, PH), lambda i: (0, 0, 0)),    # W1
                pl.BlockSpec((NUM_LAYERS, PH, PD), lambda i: (0, 0, 0)),    # W2
                pl.BlockSpec((PD, PD), lambda i: (0, 0)),                   # mavg
                pl.BlockSpec((2 * NUM_LAYERS + 2, PH), lambda i: (0, 0)),   # params
            ],
            out_specs=pl.BlockSpec((tile_r, PD), lambda i: (i, 0)),
        ),
        compiler_params=pltpu.CompilerParams(
            dimension_semantics=("parallel",),
            vmem_limit_bytes=vmem_budget),
    )(xp, w1_big, w2_big, mavg, params)

    out = out.reshape(n_rows * PACK, D)
    if n_rows * PACK != N:
        out = out[:N]
    return out.reshape(B, L, D)


def mamba_encoder_ref(src, w1, b1, w2, b2, gamma, beta):
    """Pure-JAX f32 reference of the same semantics."""
    x = src.astype(jnp.float32)
    for l in range(NUM_LAYERS):
        h = jnp.maximum(x @ w1[l] + b1[l], 0.0)
        x = x + h @ w2[l] + b2[l]
    mu = jnp.mean(x, axis=-1, keepdims=True)
    var = jnp.mean((x - mu) ** 2, axis=-1, keepdims=True)
    xn = (x - mu) * jax.lax.rsqrt(var + LN_EPS)
    return xn * gamma + beta


if __name__ == "__main__":
    key = jax.random.PRNGKey(0)
    k_src, k_w1, k_b1, k_w2, k_b2, k_g, k_bt = jax.random.split(key, 7)

    B, L = 2, 8
    src = jax.random.normal(k_src, (B, L, D_MODEL), dtype=jnp.float32)

    # Deterministic per-layer parameters (each "clone" gets its own slice).
    w1 = 0.1 * jax.random.normal(k_w1, (NUM_LAYERS, D_MODEL, D_HIDDEN), jnp.float32)
    b1 = 0.1 * jax.random.normal(k_b1, (NUM_LAYERS, D_HIDDEN), jnp.float32)
    w2 = 0.1 * jax.random.normal(k_w2, (NUM_LAYERS, D_HIDDEN, D_MODEL), jnp.float32)
    b2 = 0.1 * jax.random.normal(k_b2, (NUM_LAYERS, D_MODEL), jnp.float32)
    gamma = jnp.ones((D_MODEL,), jnp.float32)
    beta = jnp.zeros((D_MODEL,), jnp.float32)

    out = mamba_encoder(src, w1, b1, w2, b2, gamma, beta)
    out = jax.block_until_ready(out)

    ref = mamba_encoder_ref(src, w1, b1, w2, b2, gamma, beta)
    assert out.shape == (B, L, D_MODEL)
    # bf16 matmul operands (f32 accumulation) -> bf16-level tolerance
    assert jnp.allclose(out, ref, atol=3e-2, rtol=3e-2), "mismatch vs reference"

    print("KERNEL_OK")
</pallas_src>

<mosaic_0001>
module attributes {stable_mosaic.version = 11 : i64} {
  func.func @mamba_encoder_kernel(%arg0: i32, %arg1: memref<4x128xf32, #tpu.memory_space<vmem>>, %arg2: memref<2x128x256xbf16, #tpu.memory_space<vmem>>, %arg3: memref<2x256x128xbf16, #tpu.memory_space<vmem>>, %arg4: memref<128x128xf32, #tpu.memory_space<vmem>>, %arg5: memref<6x256xf32, #tpu.memory_space<vmem>>, %arg6: memref<4x128xf32, #tpu.memory_space<vmem>>) attributes {dimension_semantics = [#tpu.dimension_semantics<parallel>], iteration_bounds = array<i64: 1>, scalar_prefetch = 0 : i64, scratch_operands = 0 : i64, tpu.core_type = #tpu.core_type<tc>, window_params = [{transform_indices = @transform_0, window_bounds = array<i64: 4, 128>}, {pipeline_mode = #tpu.pipeline_mode<synchronous>, transform_indices = @transform_1, window_bounds = array<i64: 2, 128, 256>}, {pipeline_mode = #tpu.pipeline_mode<synchronous>, transform_indices = @transform_2, window_bounds = array<i64: 2, 256, 128>}, {pipeline_mode = #tpu.pipeline_mode<synchronous>, transform_indices = @transform_3, window_bounds = array<i64: 128, 128>}, {pipeline_mode = #tpu.pipeline_mode<synchronous>, transform_indices = @transform_4, window_bounds = array<i64: 6, 256>}, {transform_indices = @transform_5, window_bounds = array<i64: 4, 128>}]} {
    %c0 = arith.constant 0 : index
    %c0_0 = arith.constant 0 : index
    %0 = vector.load %arg1[%c0, %c0_0] : memref<4x128xf32, #tpu.memory_space<vmem>>, vector<4x128xf32>
    %1 = arith.truncf %0 : vector<4x128xf32> to vector<4x128xbf16>
    %c0_1 = arith.constant 0 : index
    %c0_2 = arith.constant 0 : index
    %c0_3 = arith.constant 0 : index
    %2 = vector.load %arg2[%c0_1, %c0_2, %c0_3] : memref<2x128x256xbf16, #tpu.memory_space<vmem>>, vector<1x128x256xbf16>
    %3 = vector.shape_cast %2 : vector<1x128x256xbf16> to vector<128x256xbf16>
    %cst = arith.constant dense<0.000000e+00> : vector<4x256xf32>
    %4 = tpu.matmul %1, %3, %cst {dimension_numbers = #tpu.dot_dimension_numbers<[1], [0], [0], [1], [0, 0, 1, 1], [], []>} : vector<4x128xbf16>, vector<128x256xbf16>, vector<4x256xf32> -> vector<4x256xf32>
    %c0_4 = arith.constant 0 : index
    %c0_5 = arith.constant 0 : index
    %5 = vector.load %arg5[%c0_4, %c0_5] : memref<6x256xf32, #tpu.memory_space<vmem>>, vector<1x256xf32>
    %6 = vector.broadcast %5 : vector<1x256xf32> to vector<4x256xf32>
    %7 = arith.addf %4, %6 : vector<4x256xf32>
    %cst_6 = arith.constant 0.000000e+00 : f32
    %8 = vector.broadcast %cst_6 : f32 to vector<4x256xf32>
    %9 = arith.maximumf %7, %8 : vector<4x256xf32>
    %10 = arith.truncf %9 : vector<4x256xf32> to vector<4x256xbf16>
    %c0_7 = arith.constant 0 : index
    %c0_8 = arith.constant 0 : index
    %c0_9 = arith.constant 0 : index
    %11 = vector.load %arg3[%c0_7, %c0_8, %c0_9] : memref<2x256x128xbf16, #tpu.memory_space<vmem>>, vector<1x256x128xbf16>
    %12 = vector.shape_cast %11 : vector<1x256x128xbf16> to vector<256x128xbf16>
    %cst_10 = arith.constant dense<0.000000e+00> : vector<4x128xf32>
    %13 = tpu.matmul %10, %12, %cst_10 {dimension_numbers = #tpu.dot_dimension_numbers<[1], [0], [0], [1], [0, 0, 1, 1], [], []>} : vector<4x256xbf16>, vector<256x128xbf16>, vector<4x128xf32> -> vector<4x128xf32>
    %14 = arith.addf %0, %13 : vector<4x128xf32>
    %c2 = arith.constant 2 : index
    %c0_11 = arith.constant 0 : index
    %15 = vector.load %arg5[%c2, %c0_11] : memref<6x256xf32, #tpu.memory_space<vmem>>, vector<1x128xf32>
    %16 = vector.broadcast %15 : vector<1x128xf32> to vector<4x128xf32>
    %17 = arith.addf %14, %16 : vector<4x128xf32>
    %18 = arith.truncf %17 : vector<4x128xf32> to vector<4x128xbf16>
    %c1 = arith.constant 1 : index
    %c0_12 = arith.constant 0 : index
    %c0_13 = arith.constant 0 : index
    %19 = vector.load %arg2[%c1, %c0_12, %c0_13] : memref<2x128x256xbf16, #tpu.memory_space<vmem>>, vector<1x128x256xbf16>
    %20 = vector.shape_cast %19 : vector<1x128x256xbf16> to vector<128x256xbf16>
    %cst_14 = arith.constant dense<0.000000e+00> : vector<4x256xf32>
    %21 = tpu.matmul %18, %20, %cst_14 {dimension_numbers = #tpu.dot_dimension_numbers<[1], [0], [0], [1], [0, 0, 1, 1], [], []>} : vector<4x128xbf16>, vector<128x256xbf16>, vector<4x256xf32> -> vector<4x256xf32>
    %c1_15 = arith.constant 1 : index
    %c0_16 = arith.constant 0 : index
    %22 = vector.load %arg5[%c1_15, %c0_16] : memref<6x256xf32, #tpu.memory_space<vmem>>, vector<1x256xf32>
    %23 = vector.broadcast %22 : vector<1x256xf32> to vector<4x256xf32>
    %24 = arith.addf %21, %23 : vector<4x256xf32>
    %cst_17 = arith.constant 0.000000e+00 : f32
    %25 = vector.broadcast %cst_17 : f32 to vector<4x256xf32>
    %26 = arith.maximumf %24, %25 : vector<4x256xf32>
    %27 = arith.truncf %26 : vector<4x256xf32> to vector<4x256xbf16>
    %c1_18 = arith.constant 1 : index
    %c0_19 = arith.constant 0 : index
    %c0_20 = arith.constant 0 : index
    %28 = vector.load %arg3[%c1_18, %c0_19, %c0_20] : memref<2x256x128xbf16, #tpu.memory_space<vmem>>, vector<1x256x128xbf16>
    %29 = vector.shape_cast %28 : vector<1x256x128xbf16> to vector<256x128xbf16>
    %cst_21 = arith.constant dense<0.000000e+00> : vector<4x128xf32>
    %30 = tpu.matmul %27, %29, %cst_21 {dimension_numbers = #tpu.dot_dimension_numbers<[1], [0], [0], [1], [0, 0, 1, 1], [], []>} : vector<4x256xbf16>, vector<256x128xbf16>, vector<4x128xf32> -> vector<4x128xf32>
    %31 = arith.addf %17, %30 : vector<4x128xf32>
    %c3 = arith.constant 3 : index
    %c0_22 = arith.constant 0 : index
    %32 = vector.load %arg5[%c3, %c0_22] : memref<6x256xf32, #tpu.memory_space<vmem>>, vector<1x128xf32>
    %33 = vector.broadcast %32 : vector<1x128xf32> to vector<4x128xf32>
    %34 = arith.addf %31, %33 : vector<4x128xf32>
    %c0_23 = arith.constant 0 : index
    %c0_24 = arith.constant 0 : index
    %35 = vector.load %arg4[%c0_23, %c0_24] : memref<128x128xf32, #tpu.memory_space<vmem>>, vector<128x128xf32>
    %cst_25 = arith.constant dense<0.000000e+00> : vector<4x128xf32>
    %36 = tpu.matmul %34, %35, %cst_25 {dimension_numbers = #tpu.dot_dimension_numbers<[1], [0], [0], [1], [0, 0, 1, 1], [], []>} : vector<4x128xf32>, vector<128x128xf32>, vector<4x128xf32> -> vector<4x128xf32>
    %37 = arith.subf %34, %36 : vector<4x128xf32>
    %38 = arith.mulf %37, %37 : vector<4x128xf32>
    %cst_26 = arith.constant dense<0.000000e+00> : vector<4x128xf32>
    %39 = tpu.matmul %38, %35, %cst_26 {dimension_numbers = #tpu.dot_dimension_numbers<[1], [0], [0], [1], [0, 0, 1, 1], [], []>} : vector<4x128xf32>, vector<128x128xf32>, vector<4x128xf32> -> vector<4x128xf32>
    %cst_27 = arith.constant 9.99999974E-6 : f32
    %40 = vector.broadcast %cst_27 : f32 to vector<4x128xf32>
    %41 = arith.addf %39, %40 : vector<4x128xf32>
    %42 = math.rsqrt %41 : vector<4x128xf32>
    %43 = arith.mulf %37, %42 : vector<4x128xf32>
    %c4 = arith.constant 4 : index
    %c0_28 = arith.constant 0 : index
    %44 = vector.load %arg5[%c4, %c0_28] : memref<6x256xf32, #tpu.memory_space<vmem>>, vector<1x128xf32>
    %c5 = arith.constant 5 : index
    %c0_29 = arith.constant 0 : index
    %45 = vector.load %arg5[%c5, %c0_29] : memref<6x256xf32, #tpu.memory_space<vmem>>, vector<1x128xf32>
    %46 = vector.broadcast %44 : vector<1x128xf32> to vector<4x128xf32>
    %47 = arith.mulf %43, %46 : vector<4x128xf32>
    %48 = vector.broadcast %45 : vector<1x128xf32> to vector<4x128xf32>
    %49 = arith.addf %47, %48 : vector<4x128xf32>
    %c0_30 = arith.constant 0 : index
    %c0_31 = arith.constant 0 : index
    %50 = vector.load %arg6[%c0_30, %c0_31] : memref<4x128xf32, #tpu.memory_space<vmem>>, vector<4x128xf32>
    tpu.vector_store %arg6[%c0_30, %c0_31], %49 {strides = array<i32>} : memref<4x128xf32, #tpu.memory_space<vmem>>, vector<4x128xf32>,
    return
  }
  func.func @transform_0(%arg0: i32) -> (i32, i32) {
    %c0_i32 = arith.constant 0 : i32
    %c0_i32_0 = arith.constant 0 : i32
    return %arg0, %c0_i32 : i32, i32
  }
  func.func @transform_1(%arg0: i32) -> (i32, i32, i32) {
    %c0_i32 = arith.constant 0 : i32
    %c0_i32_0 = arith.constant 0 : i32
    %c0_i32_1 = arith.constant 0 : i32
    %c0_i32_2 = arith.constant 0 : i32
    return %c0_i32, %c0_i32_0, %c0_i32_1 : i32, i32, i32
  }
  func.func @transform_2(%arg0: i32) -> (i32, i32, i32) {
    %c0_i32 = arith.constant 0 : i32
    %c0_i32_0 = arith.constant 0 : i32
    %c0_i32_1 = arith.constant 0 : i32
    %c0_i32_2 = arith.constant 0 : i32
    return %c0_i32, %c0_i32_0, %c0_i32_1 : i32, i32, i32
  }
  func.func @transform_3(%arg0: i32) -> (i32, i32) {
    %c0_i32 = arith.constant 0 : i32
    %c0_i32_0 = arith.constant 0 : i32
    %c0_i32_1 = arith.constant 0 : i32
    return %c0_i32, %c0_i32_0 : i32, i32
  }
  func.func @transform_4(%arg0: i32) -> (i32, i32) {
    %c0_i32 = arith.constant 0 : i32
    %c0_i32_0 = arith.constant 0 : i32
    %c0_i32_1 = arith.constant 0 : i32
    return %c0_i32, %c0_i32_0 : i32, i32
  }
  func.func @transform_5(%arg0: i32) -> (i32, i32) {
    %c0_i32 = arith.constant 0 : i32
    %c0_i32_0 = arith.constant 0 : i32
    return %arg0, %c0_i32 : i32, i32
  }
}

</mosaic_0001>

<bundles_post_ra>
// kernel: tpu_custom_call.1
= control target key start
LH: loop header
LB: loop body
LE: loop exit
PB: predicated region body
PF: predicated region fallthrough
CT: control target
= control target key end

     0   :  { %10 = vsyncpa [#allocation3], 0  ;;  %s1572_s0 = inlined_call_operand.hbm [shape: f32[4,128], index: 0, kind: input, shape index: {}]   ;;  %s1573_s1 = inlined_call_operand.hbm [shape: bf16[2,128,256], index: 1, kind: input, shape index: {}]   ;;  %s1574_s2 = inlined_call_operand.hbm [shape: bf16[2,256,128], index: 2, kind: input, shape index: {}]   ;;  %s1575_s3 = inlined_call_operand.hbm [shape: f32[128,128], index: 3, kind: input, shape index: {}]   ;;  %s1576_s4 = inlined_call_operand.hbm [shape: f32[6,256], index: 4, kind: input, shape index: {}]   ;;  %s1577_s5 = inlined_call_operand.hbm [shape: f32[4,128], index: 5, kind: output, shape index: {}]  }
   0x1   :  { %11 = vsyncpa [#allocation6], 0 }
   0x2   :  { %12 = vsyncpa [#allocation9], 0 }
   0x3   :  { %13 = vsyncpa [#allocation4], 0  ;;  %s1418_s18 = smov [#allocation5]   ;;  %s1278_s22 = scalar_lea.hbm %s1573_s1, 4096 }
   0x4   :  { %s29_s19 = sshll.u32 %s1418_s18, 4  ;;  %p1279_p0 = scmp.ne.s32.totalorder %s1573_s1, %s1278_s22  ;;  %s30_s19 = int_to_ptr.vmem [resolvable:$true] %s29_s19 }
   0x5   :  { %p1282_p1 = scmp.lt.u32.totalorder %s1278_s22, %s1573_s1 }
   0x7   :  { %p1284_p2 = pnand %p1282_p1, %p1279_p0 }
   0x9   :  { %1287 = shalt.err (!%p1284_p2)
}
   0xa   :  { %s1288_s27 = scalar_lea.vmem %s30_s19, 4096  ;;  %p1293_p4 = scmp.lt.s32.totalorder %s30_s19, %s30_s19 }
   0xb   :  { %p1289_p3 = scmp.ne.s32.totalorder %s30_s19, %s1288_s27  ;;  %p1294_p5 = scmp.lt.s32.totalorder %s1288_s27, %s1288_s27 }
   0xd   :  { %p1295_p6 = por %p1294_p5, %p1293_p4 }
   0xf   :  { %p1296_p7 = pnand %p1295_p6, %p1289_p3 }
  0x11   :  { %1299 = shalt.err (!%p1296_p7)
}
  0x12   :  { %s1419_s28 = smov 128   ;;  %s1420_s29 = smov 8  }
  0x13   :  { %35 = dma.hbm_to_vmem [thread:$0]  %s1573_s1, 4096, %s30_s19, [#allocation6], %s1419_s28, %s1419_s28, %s1420_s29  }
  0x14   :  { %s1421_s7 = smov [#allocation8]   ;;  %s1422_s9 = smov [#allocation2]  }
  0x15   :  { %s53_s8 = sshll.u32 %s1421_s7, 4  ;;  %s20_s10 = sshll.u32 %s1422_s9, 4  ;;  %s54_s8 = int_to_ptr.vmem [resolvable:$true] %s53_s8  ;;  %s21_s10 = int_to_ptr.vmem [resolvable:$true] %s20_s10 }
  0x16   :  { %s1300_s13 = scalar_lea.hbm %s1575_s3, 2048 }
  0x17   :  { %p1301_p8 = scmp.ne.s32.totalorder %s1575_s3, %s1300_s13  ;;  %p1304_p9 = scmp.lt.u32.totalorder %s1300_s13, %s1575_s3 }
  0x19   :  { %p1306_p10 = pnand %p1304_p9, %p1301_p8 }
  0x1b   :  { %1309 = shalt.err (!%p1306_p10)
}
  0x1c   :  { %s1310_s1 = scalar_lea.vmem %s54_s8, 2048  ;;  %p1315_p12 = scmp.lt.s32.totalorder %s54_s8, %s54_s8 }
  0x1d   :  { %p1311_p11 = scmp.ne.s32.totalorder %s54_s8, %s1310_s1  ;;  %p1316_p13 = scmp.lt.s32.totalorder %s1310_s1, %s1310_s1 }
  0x1f   :  { %p1317_p0 = por %p1316_p13, %p1315_p12 }
  0x21   :  { %p1318_p1 = pnand %p1317_p0, %p1311_p11 }
  0x23   :  { %1321 = shalt.err (!%p1318_p1)
}
  0x24   :  { %59 = dma.hbm_to_vmem [thread:$0]  %s1575_s3, 2048, %s54_s8, [#allocation9], %s1419_s28, %s1419_s28, %s1420_s29  }
  0x25   :  { %s1322_s22 = scalar_lea.hbm %s1572_s0, 64 }
  0x26   :  { %p1323_p2 = scmp.ne.s32.totalorder %s1572_s0, %s1322_s22  ;;  %p1326_p3 = scmp.lt.u32.totalorder %s1322_s22, %s1572_s0 }
  0x28   :  { %p1328_p4 = pnand %p1326_p3, %p1323_p2 }
  0x2a   :  { %1331 = shalt.err (!%p1328_p4)
}
  0x2b   :  { %s1332_s27 = scalar_lea.vmem %s21_s10, 64  ;;  %p1337_p6 = scmp.lt.s32.totalorder %s21_s10, %s21_s10 }
  0x2c   :  { %p1333_p5 = scmp.ne.s32.totalorder %s21_s10, %s1332_s27  ;;  %p1338_p7 = scmp.lt.s32.totalorder %s1332_s27, %s1332_s27 }
  0x2e   :  { %p1339_p8 = por %p1338_p7, %p1337_p6 }
  0x30   :  { %p1340_p9 = pnand %p1339_p8, %p1333_p5 }
  0x32   :  { %1343 = shalt.err (!%p1340_p9)
}
  0x33   :  { %23 = dma.hbm_to_vmem [thread:$0]  %s1572_s0, 64, %s21_s10, [#allocation3]  }
  0x34   :  { %s1423_s29 = smov [#allocation7]   ;;  %s1344_s8 = scalar_lea.hbm %s1574_s2, 4096 }
  0x35   :  { %s41_s30 = sshll.u32 %s1423_s29, 4  ;;  %p1345_p10 = scmp.ne.s32.totalorder %s1574_s2, %s1344_s8  ;;  %s42_s30 = int_to_ptr.vmem [resolvable:$true] %s41_s30 }
  0x36   :  { %p1348_p11 = scmp.lt.u32.totalorder %s1344_s8, %s1574_s2 }
  0x38   :  { %p1350_p12 = pnand %p1348_p11, %p1345_p10 }
  0x3a   :  { %1353 = shalt.err (!%p1350_p12)
}
  0x3b   :  { %s1354_s14 = scalar_lea.vmem %s42_s30, 4096  ;;  %p1359_p0 = scmp.lt.s32.totalorder %s42_s30, %s42_s30 }
  0x3c   :  { %p1355_p13 = scmp.ne.s32.totalorder %s42_s30, %s1354_s14  ;;  %p1360_p1 = scmp.lt.s32.totalorder %s1354_s14, %s1354_s14 }
  0x3e   :  { %p1361_p2 = por %p1360_p1, %p1359_p0 }
  0x40   :  { %p1362_p3 = pnand %p1361_p2, %p1355_p13 }
  0x42   :  { %1365 = shalt.err (!%p1362_p3)
}
  0x43   :  { %s1424_s0 = smov 64   ;;  %s1425_s10 = smov 4  }
  0x44   :  { %47 = dma.hbm_to_vmem [thread:$0]  %s1574_s2, 4096, %s42_s30, [#allocation6], %s1424_s0, %s1424_s0, %s1425_s10  }
  0x45   :  { %s1426_s17 = smov [#allocation10]   ;;  %s1366_s20 = scalar_lea.hbm %s1576_s4, 256 }
  0x46   :  { %s66_s1 = sshll.u32 %s1426_s17, 4  ;;  %p1367_p4 = scmp.ne.s32.totalorder %s1576_s4, %s1366_s20  ;;  %s67_s1 = int_to_ptr.vmem [resolvable:$true] %s66_s1 }
  0x47   :  { %p1370_p5 = scmp.lt.u32.totalorder %s1366_s20, %s1576_s4 }
  0x49   :  { %p1372_p6 = pnand %p1370_p5, %p1367_p4 }
  0x4b   :  { %1375 = shalt.err (!%p1372_p6)
}
  0x4c   :  { %s1376_s25 = scalar_lea.vmem %s67_s1, 256  ;;  %p1381_p8 = scmp.lt.s32.totalorder %s67_s1, %s67_s1 }
  0x4d   :  { %p1377_p7 = scmp.ne.s32.totalorder %s67_s1, %s1376_s25  ;;  %p1382_p9 = scmp.lt.s32.totalorder %s1376_s25, %s1376_s25 }
  0x4f   :  { %p1383_p10 = por %p1382_p9, %p1381_p8 }
  0x51   :  { %p1384_p11 = pnand %p1383_p10, %p1377_p7 }
  0x53   :  { %1387 = shalt.err (!%p1384_p11)
}
  0x54   :  { %69 = dma.hbm_to_vmem [thread:$0]  %s1576_s4, 256, %s67_s1, [#allocation9]  }
  0x55   :  { %1410 = dma.done.wait [#allocation3], 64  }
  0x56   :  { %1411 = vsyncadd [#allocation3], 4294967232 }
  0x57   :  { %1412 = dma.done.wait [#allocation6], 8192  }
  0x58   :  { %1413 = vsyncadd [#allocation6], 4294959104 }
  0x59   :  { %1414 = dma.done.wait [#allocation9], 2304  }
  0x5a   :  { %1415 = vsyncadd [#allocation9], 4294964992  ;;  %v1427_v0 = vmov 0   ;;  %v1196_v1 = vld [vmem:[#allocation5 + $0x4] ss:$8 sps:$4 sm:$0xff]   ;;  %v1224_v15 = vld [vmem:[#allocation7 + $0x50] sm:$0xff]   ;;  %v106_v47 = vlaneseq }
  0x5b   :  { %228 = vmatprep.mubr.bf16.mxu0 %v1427_v0  ;;  %v1198_v2 = vld [vmem:[#allocation5] ss:$8 sps:$4 sm:$0xff]   ;;  %196 = vmatprep.subr.bf16.mxu0 %v1196_v1  ;;  %v1199_v3 = vld [vmem:[#allocation5 + $0x14] ss:$8 sps:$4 sm:$0xff]   ;;  %v1201_v4 = vld [vmem:[#allocation5 + $0x10] ss:$8 sps:$4 sm:$0xff]  }
  0x5c   :  { %197 = vmatpush1.bf16.msra.mxu0 %v1198_v2  ;;  %v1202_v5 = vld [vmem:[#allocation5 + $0x24] ss:$8 sps:$4 sm:$0xff]   ;;  %v1204_v6 = vld [vmem:[#allocation5 + $0x20] ss:$8 sps:$4 sm:$0xff]   ;;  %v1205_v7 = vld [vmem:[#allocation5 + $0x34] ss:$8 sps:$4 sm:$0xff]  }
  0x5d   :  { %198 = vmatprep.subr.bf16.mxu0 %v1199_v3  ;;  %v1207_v8 = vld [vmem:[#allocation5 + $0x30] ss:$8 sps:$4 sm:$0xff]   ;;  %v1208_v9 = vld [vmem:[#allocation5 + $0x44] ss:$8 sps:$4 sm:$0xff]   ;;  %v1210_v12 = vld [vmem:[#allocation5 + $0x40] ss:$8 sps:$4 sm:$0xff]  }
  0x5e   :  { %v1220_v10 = vld [vmem:[#allocation7 + $0x40] sm:$0xff]   ;;  %v1222_v13 = vld [vmem:[#allocation7 + $0x48] sm:$0xff]   ;;  %v1211_v16 = vld [vmem:[#allocation5 + $0x54] ss:$8 sps:$4 sm:$0xff]   ;;  %v1526_v48 = vshrl.u32 %v106_v47, 7  ;;  %vm1429_vm0 = vmmov 0  }
  0x5f   :  { %v1221_v11 = vld [vmem:[#allocation7] sm:$0xff]   ;;  %986 = vmatprep.subr.bf16.mxu1 %v1220_v10  ;;  %v1223_v14 = vld [vmem:[#allocation7 + $0x8] sm:$0xff]   ;;  %v1213_v17 = vld [vmem:[#allocation5 + $0x50] ss:$8 sps:$4 sm:$0xff]   ;;  %s1431_s4 = smov [#allocation11]  }
  0x60   :  { %199 = vmatpush1.bf16.msra.mxu0 %v1201_v4  ;;  %987 = vmatpush3.bf16.msra.mxu1 %v1221_v11  ;;  %v1225_v18 = vld [vmem:[#allocation7 + $0x10] sm:$0xff]   ;;  %v1226_v19 = vld [vmem:[#allocation7 + $0x58] sm:$0xff]   ;;  %v1214_v20 = vld [vmem:[#allocation5 + $0x64] ss:$8 sps:$4 sm:$0xff]   ;;  %v108_v49 = vsub.s32 0, %v1526_v48  ;;  %v112_v51 = vsub.s32 1, %v1526_v48 }
  0x61   :  { %200 = vmatprep.subr.bf16.mxu0 %v1202_v5  ;;  %988 = vmatprep.subr.bf16.mxu1 %v1222_v13  ;;  %v1216_v21 = vld [vmem:[#allocation5 + $0x60] ss:$8 sps:$4 sm:$0xff]   ;;  %v1217_v22 = vld [vmem:[#allocation5 + $0x74] ss:$8 sps:$4 sm:$0xff]   ;;  %v1219_v26 = vld [vmem:[#allocation5 + $0x70] ss:$8 sps:$4 sm:$0xff]  }
  0x62   :  { %v1227_v23 = vld [vmem:[#allocation7 + $0x18] sm:$0xff]   ;;  %v1228_v24 = vld [vmem:[#allocation7 + $0x60] sm:$0xff]   ;;  %v1230_v28 = vld [vmem:[#allocation7 + $0x68] sm:$0xff]   ;;  %s911_s27 = sshll.u32 %s1431_s4, 4  ;;  %s912_s27 = int_to_ptr.vmem [resolvable:$true] %s911_s27 }
  0x63   :  { %v1229_v25 = vld [vmem:[#allocation7 + $0x20] sm:$0xff]   ;;  %v1522_v27 = vld [vmem:[#allocation2] sm:$0xf]  ;;  %v1231_v29 = vld [vmem:[#allocation7 + $0x28] sm:$0xff]   ;;  %s1388_s3 = scalar_lea.vmem %s912_s27, 64  ;;  %p1393_p13 = scmp.lt.s32.totalorder %s912_s27, %s912_s27 }
  0x64   :  { %201 = vmatpush1.bf16.msra.mxu0 %v1204_v6  ;;  %989 = vmatpush3.bf16.msra.mxu1 %v1223_v14  ;;  %v87_v30 = vpack.c.bf16 %v1522_v27, %v1522_v27  ;;  %v1232_v31 = vld [vmem:[#allocation7 + $0x70] sm:$0xff]   ;;  %v1234_v33 = vld [vmem:[#allocation7 + $0x78] sm:$0xff]   ;;  %v1236_v35 = vld [vmem:[#allocation5 + $0x80] ss:$8 sps:$4 sm:$0xff]   ;;  %p1389_p12 = scmp.ne.s32.totalorder %s912_s27, %s1388_s3  ;;  %p1394_p0 = scmp.lt.s32.totalorder %s1388_s3, %s1388_s3 }
  0x65   :  { %202 = vmatprep.subr.bf16.mxu0 %v1205_v7  ;;  %990 = vmatprep.subr.bf16.mxu1 %v1224_v15  ;;  %v1233_v32 = vld [vmem:[#allocation7 + $0x30] sm:$0xff]   ;;  %v1235_v34 = vld [vmem:[#allocation7 + $0x38] sm:$0xff]   ;;  %v1238_v36 = vld [vmem:[#allocation5 + $0x84] ss:$8 sps:$4 sm:$0xff]  }
  0x66   :  { %v1241_v37 = vld [vmem:[#allocation5 + $0x94] ss:$8 sps:$4 sm:$0xff]   ;;  %v1239_v38 = vld [vmem:[#allocation5 + $0x90] ss:$8 sps:$4 sm:$0xff]   ;;  %v1244_v39 = vld [vmem:[#allocation5 + $0xa4] ss:$8 sps:$4 sm:$0xff]   ;;  %p1395_p1 = por %p1394_p0, %p1393_p13 }
  0x67   :  { %v1242_v40 = vld [vmem:[#allocation5 + $0xa0] ss:$8 sps:$4 sm:$0xff]   ;;  %v1247_v41 = vld [vmem:[#allocation5 + $0xb4] ss:$8 sps:$4 sm:$0xff]   ;;  %v1245_v42 = vld [vmem:[#allocation5 + $0xb0] ss:$8 sps:$4 sm:$0xff]  }
  0x68   :  { %203 = vmatpush1.bf16.msra.mxu0 %v1207_v8  ;;  %991 = vmatpush3.bf16.msra.mxu1 %v1225_v18  ;;  %v1250_v43 = vld [vmem:[#allocation5 + $0xc4] ss:$8 sps:$4 sm:$0xff]   ;;  %v1248_v44 = vld [vmem:[#allocation5 + $0xc0] ss:$8 sps:$4 sm:$0xff]   ;;  %v1253_v45 = vld [vmem:[#allocation5 + $0xd4] ss:$8 sps:$4 sm:$0xff]   ;;  %p1396_p2 = pnand %p1395_p1, %p1389_p12 }
  0x69   :  { %204 = vmatprep.subr.bf16.mxu0 %v1208_v9  ;;  %992 = vmatprep.subr.bf16.mxu1 %v1226_v19  ;;  %v1251_v46 = vld [vmem:[#allocation5 + $0xd0] ss:$8 sps:$4 sm:$0xff]   ;;  %v104_v50 = vld [vmem:[#allocation10] ss:$8 sm:$0x3] }
  0x6a   :  { %v109_v52 = vrot.slane %v104_v50, %v108_v49  ;;  %v113_v53 = vrot.slane %v104_v50, %v112_v51  ;;  %v1254_v1 = vld [vmem:[#allocation5 + $0xe0] ss:$8 sps:$4 sm:$0xff]   ;;  %v1259_v2 = vld [vmem:[#allocation5 + $0xf4] ss:$8 sps:$4 sm:$0xff]   ;;  %v1257_v3 = vld [vmem:[#allocation5 + $0xf0] ss:$8 sps:$4 sm:$0xff]  }
  0x6b   :  { %v1260_v4 = vld [vmem:[#allocation7 + $0xc0] sm:$0xff]   ;;  %v1262_v6 = vld [vmem:[#allocation7 + $0xc8] sm:$0xff]   ;;  %v1264_v8 = vld [vmem:[#allocation7 + $0xd0] sm:$0xff]  }
  0x6c   :  { %205 = vmatpush1.bf16.msra.mxu0 %v1210_v12  ;;  %993 = vmatpush3.bf16.msra.mxu1 %v1227_v23  ;;  %v1261_v5 = vld [vmem:[#allocation7 + $0x80] sm:$0xff]   ;;  %v1263_v7 = vld [vmem:[#allocation7 + $0x88] sm:$0xff]   ;;  %v1265_v9 = vld [vmem:[#allocation7 + $0x90] sm:$0xff]  }
  0x6d   :  { %206 = vmatprep.subr.bf16.mxu0 %v1211_v16  ;;  %994 = vmatprep.subr.bf16.mxu1 %v1228_v24  ;;  %v1266_v10 = vld [vmem:[#allocation7 + $0xd8] sm:$0xff]   ;;  %v1268_v12 = vld [vmem:[#allocation7 + $0xe0] sm:$0xff]   ;;  %v1270_v14 = vld [vmem:[#allocation7 + $0xe8] sm:$0xff]  }
  0x6e   :  { %v1267_v11 = vld [vmem:[#allocation7 + $0x98] sm:$0xff]   ;;  %v1269_v13 = vld [vmem:[#allocation7 + $0xa0] sm:$0xff]   ;;  %v1271_v15 = vld [vmem:[#allocation7 + $0xa8] sm:$0xff]  }
  0x6f   :  { %v431_v50 = vld [vmem:[#allocation10 + $0x1] ss:$8 sm:$0x3] }
  0x70   :  { %207 = vmatpush1.bf16.msra.mxu0 %v1213_v17  ;;  %995 = vmatpush3.bf16.msra.mxu1 %v1229_v25  ;;  %v1272_v25 = vld [vmem:[#allocation7 + $0xf0] sm:$0xff]   ;;  %v752_v48 = vld [vmem:[#allocation8 + $0x60] sm:$0xff] }
  0x71   :  { %208 = vmatprep.subr.bf16.mxu0 %v1214_v20  ;;  %996 = vmatprep.subr.bf16.mxu1 %v1230_v28  ;;  %v410_v20 = vld [vmem:[#allocation10 + $0x2] ss:$0 sm:$0xff]  ;;  %v1274_v28 = vld [vmem:[#allocation7 + $0xf8] sm:$0xff]  }
  0x74   :  { %209 = vmatpush1.bf16.msra.mxu0 %v1216_v21  ;;  %997 = vmatpush3.bf16.msra.mxu1 %v1231_v29  ;;  %v1275_v29 = vld [vmem:[#allocation7 + $0xb8] sm:$0xff]  }
  0x75   :  { %210 = vmatprep.subr.bf16.mxu0 %v1217_v22  ;;  %998 = vmatprep.subr.bf16.mxu1 %v1232_v31  ;;  %v741_v31 = vld [vmem:[#allocation8 + $0x8] sm:$0xff] }
  0x78   :  { %211 = vmatpush1.bf16.msra.mxu0 %v1219_v26  ;;  %999 = vmatpush3.bf16.msra.mxu1 %v1233_v32  ;;  %v1273_v26 = vld [vmem:[#allocation7 + $0xb0] sm:$0xff]  }
  0x79   :  { %1000 = vmatprep.subr.bf16.mxu1 %v1234_v33  ;;  %523 = vmatprep.subr.bf16.mxu0 %v1238_v36  ;;  %v742_v32 = vld [vmem:[#allocation8 + $0x10] sm:$0xff]  ;;  %v1428_v33 = vmov 0.0|0.0   ;;  %v744_v36 = vld [vmem:[#allocation8 + $0x20] sm:$0xff] }
  0x7b   :  { %229 = vmatmul.mubr.bf16.vlgmr.msra.gmra.mrb[0].mxu0 %v87_v30  ;;  %v740_v30 = vld [vmem:[#allocation8] sm:$0xff] }
  0x7c   :  { %555 = vmatprep.mubr.bf16.mxu0 %v1427_v0  ;;  %1001 = vmatpush3.bf16.msra.mxu1 %v1235_v34  ;;  %v1256_v0 = vld [vmem:[#allocation5 + $0xe4] ss:$8 sps:$4 sm:$0xff]   ;;  %v743_v34 = vld [vmem:[#allocation8 + $0x18] sm:$0xff] }
  0x7d   :  { %524 = vmatpush1.bf16.msra.mxu0 %v1236_v35  ;;  %1008 = vmatprep.subr.bf16.mxu1 %v1260_v4  ;;  %v1138_v35 = vpack.c.bf16 %v743_v34, %v742_v32 }
  0x7e   :  { %525 = vmatprep.subr.bf16.mxu0 %v1241_v37  ;;  %v745_v37 = vld [vmem:[#allocation8 + $0x28] sm:$0xff] }
  0x81   :  { %526 = vmatpush1.bf16.msra.mxu0 %v1239_v38  ;;  %v1141_v38 = vpack.c.bf16 %v745_v37, %v744_v36 }
  0x82   :  { %527 = vmatprep.subr.bf16.mxu0 %v1244_v39  ;;  %v746_v39 = vld [vmem:[#allocation8 + $0x30] sm:$0xff] }
  0x85   :  { %528 = vmatpush1.bf16.msra.mxu0 %v1242_v40  ;;  %v747_v40 = vld [vmem:[#allocation8 + $0x38] sm:$0xff] }
  0x86   :  { %529 = vmatprep.subr.bf16.mxu0 %v1247_v41  ;;  %v1144_v41 = vpack.c.bf16 %v747_v40, %v746_v39 }
  0x89   :  { %530 = vmatpush1.bf16.msra.mxu0 %v1245_v42  ;;  %v748_v42 = vld [vmem:[#allocation8 + $0x40] sm:$0xff] }
  0x8a   :  { %531 = vmatprep.subr.bf16.mxu0 %v1250_v43  ;;  %v749_v43 = vld [vmem:[#allocation8 + $0x48] sm:$0xff] }
  0x8d   :  { %532 = vmatpush1.bf16.msra.mxu0 %v1248_v44  ;;  %v1147_v44 = vpack.c.bf16 %v749_v43, %v748_v42 }
  0x8e   :  { %533 = vmatprep.subr.bf16.mxu0 %v1253_v45  ;;  %v750_v45 = vld [vmem:[#allocation8 + $0x50] sm:$0xff] }
  0x91   :  { %534 = vmatpush1.bf16.msra.mxu0 %v1251_v46  ;;  %v751_v46 = vld [vmem:[#allocation8 + $0x58] sm:$0xff] }
  0x92   :  { %535 = vmatprep.subr.bf16.mxu0 %v1256_v0  ;;  %v1150_v47 = vpack.c.bf16 %v751_v46, %v750_v45  ;;  %v754_v0 = vld [vmem:[#allocation8 + $0x70] sm:$0xff] }
  0x95   :  { %536 = vmatpush1.bf16.msra.mxu0 %v1254_v1  ;;  %v755_v1 = vld [vmem:[#allocation8 + $0x78] sm:$0xff] }
  0x96   :  { %537 = vmatprep.subr.bf16.mxu0 %v1259_v2  ;;  %v1156_v2 = vpack.c.bf16 %v755_v1, %v754_v0 }
  0x99   :  { %538 = vmatpush1.bf16.msra.mxu0 %v1257_v3  ;;  %v1430_v3 = vmov 0.0  }
  0x9a   :  { %1134 = vmatprep.subr.bf16.mxu0 %v1428_v33 }
 0x14e   :  { %v230_v54 = vpop.f32.mrb[0].mxu0 }
 0x14f   :  { %v231_v55 = vadd.f32 %v230_v54, %v109_v52  ;;  %v232_v56 = vpop.f32.mrb[1].mxu0  ;;  %v436_v52 = vrot.slane %v431_v50, %v108_v49  ;;  %v753_v49 = vld [vmem:[#allocation8 + $0x68] sm:$0xff] }
 0x150   :  { %v233_v57 = vadd.f32 %v232_v56, %v113_v53  ;;  %v234_v58 = vpop.f32.mrb[2].mxu0  ;;  %v440_v53 = vrot.slane %v431_v50, %v112_v51  ;;  %v1153_v51 = vpack.c.bf16 %v753_v49, %v752_v48 }
 0x151   :  { %v237_v59 = vmax.f32 %v231_v55, 0.0  ;;  %v235_v60 = vpop.f32.mrb[3].mxu0 }
 0x152   :  { %v238_v61 = vmax.f32 %v233_v57, 0.0 }
 0x153   :  { %v239_v63 = vpack.c.bf16 %v237_v59, %v237_v59 }
 0x154   :  { %v240_v62 = vpack.c.bf16 %v238_v61, %v238_v61 }
 0x156   :  { %401 = vmatprep.mubr.bf16.mxu1 %v240_v62 }
 0x157   :  { %402 = vmatmul.mubr.bf16.vlgmr.msra.gmra.mrb[0].mxu1 %v239_v63 }
 0x158   :  { %1009 = vmatpush3.bf16.msra.mxu1 %v1261_v5 }
 0x159   :  { %1010 = vmatprep.subr.bf16.mxu1 %v1262_v6 }
 0x15c   :  { %1011 = vmatpush3.bf16.msra.mxu1 %v1263_v7 }
 0x15d   :  { %1012 = vmatprep.subr.bf16.mxu1 %v1264_v8  ;;  %v738_v8 = vld [vmem:[#allocation10 + $0x3] ss:$0 sm:$0xff] }
 0x160   :  { %1013 = vmatpush3.bf16.msra.mxu1 %v1265_v9 }
 0x161   :  { %1014 = vmatprep.subr.bf16.mxu1 %v1266_v10 }
 0x164   :  { %1015 = vmatpush3.bf16.msra.mxu1 %v1267_v11 }
 0x165   :  { %1016 = vmatprep.subr.bf16.mxu1 %v1268_v12 }
 0x168   :  { %1017 = vmatpush3.bf16.msra.mxu1 %v1269_v13 }
 0x169   :  { %1018 = vmatprep.subr.bf16.mxu1 %v1270_v14 }
 0x16c   :  { %1019 = vmatpush3.bf16.msra.mxu1 %v1271_v15 }
 0x16d   :  { %1020 = vmatprep.subr.bf16.mxu1 %v1272_v25 }
 0x170   :  { %1021 = vmatpush3.bf16.msra.mxu1 %v1273_v26 }
 0x171   :  { %1022 = vmatprep.subr.bf16.mxu1 %v1274_v28 }
 0x174   :  { %1023 = vmatpush3.bf16.msra.mxu1 %v1275_v29 }
 0x175   :  { %1158 = vmatprep.subr.bf16.mxu1 %v1428_v33 }
 0x22a   :  { %v1002_v16 = vpop.f32.mrb[0].mxu1 }
 0x22b   :  { %v1003_v17 = vpop.f32.mrb[1].mxu1 }
 0x22c   :  { %v1004_v18 = vadd.f32 %v1003_v17, %v1002_v16  ;;  %v1005_v19 = vpop.f32.mrb[2].mxu1 }
 0x22d   :  { %v1006_v21 = vpop.f32.mrb[3].mxu1 }
 0x22e   :  { %v409_v22 = vadd.f32 %v1004_v18, %v1522_v27  ;;  %v1135_v27 = vpack.c.bf16 %v741_v31, %v740_v30 }
 0x230   :  { %v1535_v23 = vadd.f32 %v410_v20, %v409_v22  ;;  %v900_v20 = vld [vmem:[#allocation10 + $0x4] ss:$0 sm:$0xff]  ;;  %v901_v22 = vld [vmem:[#allocation10 + $0x5] ss:$0 sm:$0xff] }
 0x232   :  { %v412_v24 = vpack.c.bf16 %v1535_v23, %v1535_v23 }
 0x234   :  { %556 = vmatmul.mubr.bf16.vlgmr.msra.gmra.mrb[4].mxu0 %v412_v24 }
 0x235   :  { %1136 = vmatpush3.bf16.msra.mxu0 %v1135_v27  ;;  %1096 = vmatprep.mubr.msk.f32.mxu0 %vm1429_vm0, %v1430_v3 }
 0x236   :  { %1137 = vmatprep.subr.bf16.mxu0 %v1428_v33 }
 0x239   :  { %1139 = vmatpush3.bf16.msra.mxu0 %v1138_v35 }
 0x23a   :  { %1140 = vmatprep.subr.bf16.mxu0 %v1428_v33 }
 0x23d   :  { %1142 = vmatpush3.bf16.msra.mxu0 %v1141_v38 }
 0x23e   :  { %1143 = vmatprep.subr.bf16.mxu0 %v1428_v33 }
 0x241   :  { %1145 = vmatpush3.bf16.msra.mxu0 %v1144_v41 }
 0x242   :  { %1146 = vmatprep.subr.bf16.mxu0 %v1428_v33 }
 0x245   :  { %1148 = vmatpush3.bf16.msra.mxu0 %v1147_v44 }
 0x246   :  { %1149 = vmatprep.subr.bf16.mxu0 %v1428_v33 }
 0x249   :  { %1151 = vmatpush3.bf16.msra.mxu0 %v1150_v47 }
 0x24a   :  { %1152 = vmatprep.subr.bf16.mxu0 %v1428_v33 }
 0x24d   :  { %1154 = vmatpush3.bf16.msra.mxu0 %v1153_v51 }
 0x24e   :  { %1155 = vmatprep.subr.bf16.mxu0 %v1428_v33 }
 0x251   :  { %1157 = vmatpush3.bf16.msra.mxu0 %v1156_v2 }
 0x307   :  { %v557_v54 = vpop.f32.mrb[4].mxu0 }
 0x308   :  { %v558_v55 = vadd.f32 %v557_v54, %v436_v52  ;;  %v559_v56 = vpop.f32.mrb[5].mxu0 }
 0x309   :  { %v560_v57 = vadd.f32 %v559_v56, %v440_v53  ;;  %v561_v58 = vpop.f32.mrb[6].mxu0 }
 0x30a   :  { %v564_v59 = vmax.f32 %v558_v55, 0.0  ;;  %v562_v60 = vpop.f32.mrb[7].mxu0 }
 0x30b   :  { %v565_v61 = vmax.f32 %v560_v57, 0.0 }
 0x30c   :  { %v566_v63 = vpack.c.bf16 %v564_v59, %v564_v59 }
 0x30d   :  { %v567_v62 = vpack.c.bf16 %v565_v61, %v565_v61 }
 0x30f   :  { %729 = vmatprep.mubr.bf16.mxu1 %v567_v62 }
 0x310   :  { %730 = vmatmul.mubr.bf16.vlgmr.msra.gmra.mrb[4].mxu1 %v566_v63 }
 0x311   :  { %1160 = vmatpush3.bf16.msra.mxu1 %v1135_v27  ;;  %1131 = vmatprep.mubr.msk.f32.mxu1 %vm1429_vm0, %v1430_v3 }
 0x312   :  { %1161 = vmatprep.subr.bf16.mxu1 %v1428_v33 }
 0x315   :  { %1163 = vmatpush3.bf16.msra.mxu1 %v1138_v35 }
 0x316   :  { %1164 = vmatprep.subr.bf16.mxu1 %v1428_v33 }
 0x319   :  { %1166 = vmatpush3.bf16.msra.mxu1 %v1141_v38 }
 0x31a   :  { %1167 = vmatprep.subr.bf16.mxu1 %v1428_v33 }
 0x31d   :  { %1169 = vmatpush3.bf16.msra.mxu1 %v1144_v41 }
 0x31e   :  { %1170 = vmatprep.subr.bf16.mxu1 %v1428_v33 }
 0x321   :  { %1172 = vmatpush3.bf16.msra.mxu1 %v1147_v44 }
 0x322   :  { %1173 = vmatprep.subr.bf16.mxu1 %v1428_v33 }
 0x325   :  { %1175 = vmatpush3.bf16.msra.mxu1 %v1150_v47 }
 0x326   :  { %1176 = vmatprep.subr.bf16.mxu1 %v1428_v33 }
 0x329   :  { %1178 = vmatpush3.bf16.msra.mxu1 %v1153_v51 }
 0x32a   :  { %1179 = vmatprep.subr.bf16.mxu1 %v1428_v33 }
 0x32d   :  { %1181 = vmatpush3.bf16.msra.mxu1 %v1156_v2 }
 0x3e3   :  { %v1024_v4 = vpop.f32.mrb[4].mxu1 }
 0x3e4   :  { %v1025_v5 = vpop.f32.mrb[5].mxu1 }
 0x3e5   :  { %v1026_v6 = vadd.f32 %v1025_v5, %v1024_v4  ;;  %v1027_v7 = vpop.f32.mrb[6].mxu1 }
 0x3e6   :  { %v1028_v9 = vpop.f32.mrb[7].mxu1 }
 0x3e7   :  { %v737_v10 = vadd.f32 %v1026_v6, %v1535_v23 }
 0x3e9   :  { %v739_v11 = vadd.f32 %v738_v8, %v737_v10 }
 0x3eb   :  { %1097 = vmatmul.mubr.f32.vlgmr.msra.gmra.mrb[8].mxu0 %v739_v11 }
 0x4be   :  { %v822_v12 = vpop.f32.mrb[8].mxu0 }
 0x4bf   :  { %v826_v13 = vsub.f32 %v739_v11, %v822_v12  ;;  %v1098_v14 = vpop.f32.mrb[9].mxu0 }
 0x4c1   :  { %v827_v15 = vmul.f32 %v826_v13, %v826_v13 }
 0x4c3   :  { %1132 = vmatmul.mubr.f32.vlgmr.msra.gmra.mrb[8].mxu1 %v827_v15 }
 0x596   :  { %v894_v16 = vpop.f32.mrb[8].mxu1 }
 0x597   :  { %v895_v17 = vadd.f32 1e-05, %v894_v16  ;;  %v1133_v18 = vpop.f32.mrb[9].mxu1 }
 0x599   :  { %1276 = vrsqrt.f32 %v895_v17 }
 0x5a3   :  { %v1277_v19 = vpop.eup %1276 }
 0x5a4   :  { %v899_v21 = vmul.f32 %v1277_v19, %v826_v13 }
 0x5a6   :  { %v902_v24 = vmul.f32 %v900_v20, %v899_v21 }
 0x5a8   :  { %v903_v25 = vadd.f32 %v902_v24, %v901_v22 }
 0x5aa   :  { %904 = vst [vmem:[#allocation11] sm:$0xf] %v903_v25 }
 0x5ab   :  { %1399 = shalt.err (!%p1396_p2)
}
 0x5ac   :  { %s1400_s30 = scalar_lea.hbm %s1577_s5, 64 }
 0x5ad   :  { %p1401_p3 = scmp.ne.s32.totalorder %s1577_s5, %s1400_s30  ;;  %p1404_p4 = scmp.lt.u32.totalorder %s1400_s30, %s1577_s5 }
 0x5af   :  { %p1406_p5 = pnand %p1404_p4, %p1401_p3 }
 0x5b1   :  { %1409 = shalt.err (!%p1406_p5)
}
 0x5b2   :  { %914 = dma.vmem_to_hbm [thread:$0]  %s912_s27, 64, %s1577_s5, [#allocation4]  }
 0x5b3   :  { %1416 = dma.done.wait [#allocation4], 64  }
 0x5b4   :  { %1417 = vsyncadd [#allocation4], 4294967232 }
 0x5b5   :  { %918 = vsyncpa [#allocation3], 1 }
 0x5b6   :  { %919 = vsyncpa [#allocation6], 1 }
 0x5b7   :  { %920 = vsyncpa [#allocation9], 1 }
 0x5b8   :  { %921 = vsyncpa [#allocation4], 1 }

</bundles_post_ra>
